<compile_context>
chip_gen: v7x
topology: tpu7x:2x2x1
jax: 0.10.0
libtpu: 0.0.40
codegen_flags: <defaults>
</compile_context>

<pallas_src>
import functools

import jax
import jax.numpy as jnp
from jax.experimental import pallas as pl
from jax.experimental.pallas import tpu as pltpu


def _round_up(v, m):
    return ((v + m - 1) // m) * m


def _utility_attention_kernel(x_ref, bias_ref, prec_ref, w_ref, out_ref):
    x = x_ref[...]                                   # (TB, 1)   batch on sublanes
    z = (x - bias_ref[...]) * prec_ref[...]          # (TB, Npad) via broadcast
    # torch.sigmoid via a single EUP tanh: sigmoid(z) = 0.5*(tanh(z/2) + 1)
    s = 0.5 * jnp.tanh(0.5 * z) + 0.5                # (TB, Npad)
    # torch.dot with softmax weights -> cross-lane reduce (XLU slot, MXU not needed)
    out_ref[...] = jnp.sum(s * w_ref[...], axis=-1, keepdims=True)  # (TB, 1)


@functools.partial(jax.jit, static_argnames=("tile_b",))
def utility_increasing_attention(x, pre_precision, bias, pre_weights, tile_b=2048):
    """x: (B,) scalar inputs; params: (nb_prim,). Returns (B,) f32."""
    B = x.shape[0]
    n = pre_weights.shape[0]
    npad = _round_up(n, 128)
    pad = npad - n

    # Once-per-call parameter preprocessing (100-element vectors: negligible).
    precision = jnp.maximum(pre_precision.astype(jnp.float32), 0.0)   # F.relu
    weights = jax.nn.softmax(pre_weights.astype(jnp.float32))         # F.softmax
    bias_p = jnp.pad(bias.astype(jnp.float32), (0, pad)).reshape(1, npad)
    prec_p = jnp.pad(precision, (0, pad)).reshape(1, npad)
    w_p = jnp.pad(weights, (0, pad)).reshape(1, npad)   # padded weights are exactly 0

    # Batch tiling: TB multiple of 8, clamped to the (padded) batch size.
    TB = min(int(tile_b), _round_up(B, 8))
    TB = _round_up(TB, 8)
    Bpad = _round_up(B, TB)
    x2 = jnp.pad(x.astype(jnp.float32), (0, Bpad - B)).reshape(Bpad, 1)
    grid = (Bpad // TB,)

    out = pl.pallas_call(
        _utility_attention_kernel,
        out_shape=jax.ShapeDtypeStruct((Bpad, 1), jnp.float32),
        grid=grid,
        in_specs=[
            pl.BlockSpec((TB, 1), lambda i: (i, 0)),      # x: one batch tile / step
            pl.BlockSpec((1, npad), lambda i: (0, 0)),    # bias (resident)
            pl.BlockSpec((1, npad), lambda i: (0, 0)),    # relu(pre_precision)
            pl.BlockSpec((1, npad), lambda i: (0, 0)),    # softmax(pre_weights)
        ],
        out_specs=pl.BlockSpec((TB, 1), lambda i: (i, 0)),
        compiler_params=pltpu.CompilerParams(
            dimension_semantics=("parallel",),            # v7x: shard batch over 2 TCs
        ),
    )(x2, bias_p, prec_p, w_p)
    return out[:B, 0]


def _reference(x, pre_precision, bias, pre_weights):
    precision = jnp.maximum(pre_precision, 0.0)
    w = jax.nn.softmax(pre_weights)
    z = (x[:, None] - bias[None, :]) * precision[None, :]
    s = jax.nn.sigmoid(z)
    return s @ w


if __name__ == "__main__":
    nb_prim = 100   # default from the PyTorch module
    B = 1024        # batch of scalar inputs (small; tile_b=256 -> 4 grid steps)

    key = jax.random.PRNGKey(0)
    k1, k2, k3 = jax.random.split(key, 3)

    # Deterministic parameter init matching __init__ shapes/semantics:
    #   pre_precision = rand(nb_prim) * nb_prim
    #   bias          = linspace(1/n, 1 - 1/n, n)
    #   pre_weights   = randn(nb_prim) * 0.1 + log(2)
    pre_precision = jax.random.uniform(k1, (nb_prim,), jnp.float32) * nb_prim
    bias = jnp.linspace(1.0 / nb_prim, 1.0 - 1.0 / nb_prim, nb_prim, dtype=jnp.float32)
    pre_weights = jax.random.normal(k2, (nb_prim,), jnp.float32) * 0.1 + jnp.log(2.0)

    x = jax.random.uniform(k3, (B,), jnp.float32)

    out = utility_increasing_attention(x, pre_precision, bias, pre_weights, tile_b=256)
    out = jax.block_until_ready(out)

    ref = _reference(x, pre_precision, bias, pre_weights)
    assert out.shape == (B,)
    assert jnp.allclose(out, ref, atol=1e-5, rtol=1e-5), (out, ref)

    print("KERNEL_OK")
</pallas_src>

<mosaic_0001>
module attributes {stable_mosaic.version = 11 : i64} {
  func.func @_utility_attention_kernel(%arg0: i32, %arg1: memref<256x1xf32, #tpu.memory_space<vmem>>, %arg2: memref<1x128xf32, #tpu.memory_space<vmem>>, %arg3: memref<1x128xf32, #tpu.memory_space<vmem>>, %arg4: memref<1x128xf32, #tpu.memory_space<vmem>>, %arg5: memref<256x1xf32, #tpu.memory_space<vmem>>) attributes {dimension_semantics = [#tpu.dimension_semantics<parallel>], iteration_bounds = array<i64: 4>, scalar_prefetch = 0 : i64, scratch_operands = 0 : i64, tpu.core_type = #tpu.core_type<tc>, window_params = [{transform_indices = @transform_0, window_bounds = array<i64: 256, 1>}, {pipeline_mode = #tpu.pipeline_mode<synchronous>, transform_indices = @transform_1, window_bounds = array<i64: 1, 128>}, {pipeline_mode = #tpu.pipeline_mode<synchronous>, transform_indices = @transform_2, window_bounds = array<i64: 1, 128>}, {pipeline_mode = #tpu.pipeline_mode<synchronous>, transform_indices = @transform_3, window_bounds = array<i64: 1, 128>}, {transform_indices = @transform_4, window_bounds = array<i64: 256, 1>}]} {
    %c0 = arith.constant 0 : index
    %c0_0 = arith.constant 0 : index
    %0 = vector.load %arg1[%c0, %c0_0] : memref<256x1xf32, #tpu.memory_space<vmem>>, vector<256x1xf32>
    %c0_1 = arith.constant 0 : index
    %c0_2 = arith.constant 0 : index
    %1 = vector.load %arg2[%c0_1, %c0_2] : memref<1x128xf32, #tpu.memory_space<vmem>>, vector<1x128xf32>
    %2 = vector.broadcast %0 : vector<256x1xf32> to vector<256x128xf32>
    %3 = vector.broadcast %1 : vector<1x128xf32> to vector<256x128xf32>
    %4 = arith.subf %2, %3 : vector<256x128xf32>
    %c0_3 = arith.constant 0 : index
    %c0_4 = arith.constant 0 : index
    %5 = vector.load %arg3[%c0_3, %c0_4] : memref<1x128xf32, #tpu.memory_space<vmem>>, vector<1x128xf32>
    %6 = vector.broadcast %5 : vector<1x128xf32> to vector<256x128xf32>
    %7 = arith.mulf %4, %6 : vector<256x128xf32>
    %cst = arith.constant 5.000000e-01 : f32
    %8 = vector.broadcast %cst : f32 to vector<256x128xf32>
    %9 = arith.mulf %8, %7 : vector<256x128xf32>
    %10 = math.tanh %9 : vector<256x128xf32>
    %cst_5 = arith.constant 5.000000e-01 : f32
    %11 = vector.broadcast %cst_5 : f32 to vector<256x128xf32>
    %12 = arith.mulf %11, %10 : vector<256x128xf32>
    %cst_6 = arith.constant 5.000000e-01 : f32
    %13 = vector.broadcast %cst_6 : f32 to vector<256x128xf32>
    %14 = arith.addf %12, %13 : vector<256x128xf32>
    %c0_7 = arith.constant 0 : index
    %c0_8 = arith.constant 0 : index
    %15 = vector.load %arg4[%c0_7, %c0_8] : memref<1x128xf32, #tpu.memory_space<vmem>>, vector<1x128xf32>
    %16 = vector.broadcast %15 : vector<1x128xf32> to vector<256x128xf32>
    %17 = arith.mulf %14, %16 : vector<256x128xf32>
    %cst_9 = arith.constant dense<0.000000e+00> : vector<256xf32>
    %18 = vector.multi_reduction <add>, %17, %cst_9 [1] : vector<256x128xf32> to vector<256xf32>
    %19 = vector.shape_cast %18 : vector<256xf32> to vector<256x1xf32>
    %c0_10 = arith.constant 0 : index
    %c0_11 = arith.constant 0 : index
    %20 = vector.load %arg5[%c0_10, %c0_11] : memref<256x1xf32, #tpu.memory_space<vmem>>, vector<256x1xf32>
    tpu.vector_store %arg5[%c0_10, %c0_11], %19 {strides = array<i32>} : memref<256x1xf32, #tpu.memory_space<vmem>>, vector<256x1xf32>,
    return
  }
  func.func @transform_0(%arg0: i32) -> (i32, i32) {
    %c0_i32 = arith.constant 0 : i32
    %c0_i32_0 = arith.constant 0 : i32
    return %arg0, %c0_i32 : i32, i32
  }
  func.func @transform_1(%arg0: i32) -> (i32, i32) {
    %c0_i32 = arith.constant 0 : i32
    %c0_i32_0 = arith.constant 0 : i32
    %c0_i32_1 = arith.constant 0 : i32
    return %c0_i32, %c0_i32_0 : i32, i32
  }
  func.func @transform_2(%arg0: i32) -> (i32, i32) {
    %c0_i32 = arith.constant 0 : i32
    %c0_i32_0 = arith.constant 0 : i32
    %c0_i32_1 = arith.constant 0 : i32
    return %c0_i32, %c0_i32_0 : i32, i32
  }
  func.func @transform_3(%arg0: i32) -> (i32, i32) {
    %c0_i32 = arith.constant 0 : i32
    %c0_i32_0 = arith.constant 0 : i32
    %c0_i32_1 = arith.constant 0 : i32
    return %c0_i32, %c0_i32_0 : i32, i32
  }
  func.func @transform_4(%arg0: i32) -> (i32, i32) {
    %c0_i32 = arith.constant 0 : i32
    %c0_i32_0 = arith.constant 0 : i32
    return %arg0, %c0_i32 : i32, i32
  }
}

</mosaic_0001>

<bundles_post_ra>
// kernel: utility_increasing_attention.1
= control target key start
LH: loop header
LB: loop body
LE: loop exit
PB: predicated region body
PF: predicated region fallthrough
CT: control target
= control target key end

     0   :  { %s914_s15 = smov 0   ;;  %s1149_s0 = inlined_call_operand.vmem [shape: f32[1024,1], index: 0, kind: input, shape index: {}]   ;;  %s1150_s1 = inlined_call_operand.vmem [shape: f32[1,128], index: 1, kind: input, shape index: {}]   ;;  %s1151_s2 = inlined_call_operand.vmem [shape: f32[1,128], index: 2, kind: input, shape index: {}]   ;;  %s1152_s3 = inlined_call_operand.vmem [shape: f32[1,128], index: 3, kind: input, shape index: {}]   ;;  %s1153_s4 = inlined_call_operand.vmem [shape: f32[1024,1], index: 4, kind: output, shape index: {}]  }
   0x1 LB: > { %s791_s16 = sadd.s32 4294967295, %s886_s15   ;;  %p795_p0 = scmp.ge.s32.totalorder %s886_s15, 1  ;;  %s886_s15 = sphi %s914_s15, %s14_s15  }
   0x2   : > { %p163_p1 = scmp.lt.s32.totalorder %s886_s15, 5 }
   0x4   : > { %p164_p2 = pnand %p795_p0, %p163_p1 }
   0x5   : > { %s796_s17 = sshll.u32 (!%p164_p2), %s791_s16, 5  ;;  %v888_v0 = vmov (!%p164_p2), 0   ;;  %v967_v33 = vld [vmem:[%s1150_s1] ss:$0 sm:$0xff] (!%p164_p2)  ;;  %vm702_vm0 = vcmask (!%p164_p2), 7168  }
   0x6   : > { %167 = sbr.rel (%p164_p2) target bundleno = 377 (0x179), region = 36  ;;  %815 = vset.pattern.permute.xlu1 (!%p164_p2), %v888_v0  ;;  %814 = vset.pattern.permute.xlu0 (!%p164_p2), %v888_v0  ;;  %p190_p3 = scmp.lt.s32.totalorder (!%p164_p2), %s796_s17, 127  ;;  %v972_v34 = vld [vmem:[%s1151_s2] ss:$0 sm:$0xff] (!%p164_p2) }
   0xd   : > { %s1155_s17 = smov (!%p190_p3, %s796_s17), 127 }
   0xe   : > { %s797_s18 = sshll.u32 %s1155_s17, 3 }
   0xf   : > { %s930_s21 = scalar_lea.vmem %s1149_s0, %s797_s18  ;;  %s1080_s30 = scalar_lea.vmem %s1153_s4, %s797_s18 }
  0x10   : > { %v203_v1 = vld [vmem:[%s930_s21 + $0x10] sm:$0xff]  ;;  %v201_v2 = vld [vmem:[%s930_s21] sm:$0xff]  ;;  %v204_v3 = vld [vmem:[%s930_s21 + $0x18] sm:$0xff] }
  0x11   : > { %246 = vperm.xlu1 %815, %v203_v1   ;;  %236 = vperm.xlu0 %814, %v201_v2   ;;  %v202_v4 = vld [vmem:[%s930_s21 + $0x8] sm:$0xff]  ;;  %v205_v6 = vld [vmem:[%s930_s21 + $0x20] sm:$0xff]  ;;  %v208_v7 = vld [vmem:[%s930_s21 + $0x38] sm:$0xff] }
  0x12   : > { %v206_v5 = vld [vmem:[%s930_s21 + $0x28] sm:$0xff]  ;;  %v207_v8 = vld [vmem:[%s930_s21 + $0x30] sm:$0xff]  ;;  %v209_v10 = vld [vmem:[%s930_s21 + $0x40] sm:$0xff] }
  0x13   : > { %v210_v9 = vld [vmem:[%s930_s21 + $0x48] sm:$0xff]  ;;  %v212_v11 = vld [vmem:[%s930_s21 + $0x58] sm:$0xff]  ;;  %v211_v12 = vld [vmem:[%s930_s21 + $0x50] sm:$0xff] }
  0x14   : > { %v214_v13 = vld [vmem:[%s930_s21 + $0x68] sm:$0xff]  ;;  %v213_v14 = vld [vmem:[%s930_s21 + $0x60] sm:$0xff]  ;;  %v216_v15 = vld [vmem:[%s930_s21 + $0x78] sm:$0xff] }
  0x15   : > { %251 = vperm.xlu1 %815, %v204_v3   ;;  %241 = vperm.xlu0 %814, %v202_v4   ;;  %v215_v16 = vld [vmem:[%s930_s21 + $0x70] sm:$0xff]  ;;  %v218_v17 = vld [vmem:[%s930_s21 + $0x88] sm:$0xff]  ;;  %v217_v18 = vld [vmem:[%s930_s21 + $0x80] sm:$0xff] }
  0x16   : > { %v220_v19 = vld [vmem:[%s930_s21 + $0x98] sm:$0xff]  ;;  %v219_v20 = vld [vmem:[%s930_s21 + $0x90] sm:$0xff]  ;;  %v222_v21 = vld [vmem:[%s930_s21 + $0xa8] sm:$0xff] }
  0x17   : > { %v221_v22 = vld [vmem:[%s930_s21 + $0xa0] sm:$0xff]  ;;  %v224_v23 = vld [vmem:[%s930_s21 + $0xb8] sm:$0xff]  ;;  %v223_v24 = vld [vmem:[%s930_s21 + $0xb0] sm:$0xff] }
  0x18   : > { %v226_v25 = vld [vmem:[%s930_s21 + $0xc8] sm:$0xff]  ;;  %v225_v26 = vld [vmem:[%s930_s21 + $0xc0] sm:$0xff]  ;;  %v228_v27 = vld [vmem:[%s930_s21 + $0xd8] sm:$0xff] }
  0x19   : > { %261 = vperm.xlu1 %815, %v206_v5   ;;  %256 = vperm.xlu0 %814, %v205_v6   ;;  %v227_v28 = vld [vmem:[%s930_s21 + $0xd0] sm:$0xff]  ;;  %v230_v29 = vld [vmem:[%s930_s21 + $0xe8] sm:$0xff]  ;;  %v229_v30 = vld [vmem:[%s930_s21 + $0xe0] sm:$0xff] }
  0x1a   : > { %v232_v31 = vld [vmem:[%s930_s21 + $0xf8] sm:$0xff]  ;;  %v231_v32 = vld [vmem:[%s930_s21 + $0xf0] sm:$0xff] }
  0x1d   : > { %271 = vperm.xlu1 %815, %v208_v7   ;;  %266 = vperm.xlu0 %814, %v207_v8  }
  0x21   : > { %281 = vperm.xlu1 %815, %v210_v9   ;;  %276 = vperm.xlu0 %814, %v209_v10  }
  0x25   : > { %291 = vperm.xlu1 %815, %v212_v11   ;;  %286 = vperm.xlu0 %814, %v211_v12  }
  0x29   : > { %301 = vperm.xlu1 %815, %v214_v13   ;;  %296 = vperm.xlu0 %814, %v213_v14  }
  0x2d   : > { %311 = vperm.xlu1 %815, %v216_v15   ;;  %306 = vperm.xlu0 %814, %v215_v16  }
  0x31   : > { %321 = vperm.xlu1 %815, %v218_v17   ;;  %316 = vperm.xlu0 %814, %v217_v18  }
  0x35   : > { %331 = vperm.xlu1 %815, %v220_v19   ;;  %326 = vperm.xlu0 %814, %v219_v20   ;;  %v999_v20 = vld [vmem:[%s1152_s3] ss:$0 sm:$0xff] }
  0x39   : > { %341 = vperm.xlu1 %815, %v222_v21   ;;  %336 = vperm.xlu0 %814, %v221_v22  }
  0x3d   : > { %351 = vperm.xlu1 %815, %v224_v23   ;;  %346 = vperm.xlu0 %814, %v223_v24  }
  0x41   : > { %361 = vperm.xlu1 %815, %v226_v25   ;;  %356 = vperm.xlu0 %814, %v225_v26  }
  0x45   : > { %371 = vperm.xlu1 %815, %v228_v27   ;;  %366 = vperm.xlu0 %814, %v227_v28  }
  0x49   : > { %381 = vperm.xlu1 %815, %v230_v29   ;;  %376 = vperm.xlu0 %814, %v229_v30  }
  0x4d   : > { %391 = vperm.xlu1 %815, %v232_v31   ;;  %386 = vperm.xlu0 %814, %v231_v32  }
  0x90   : > { %v247_v35 = vpop.permute.xlu1 %246  ;;  %v237_v36 = vpop.permute.xlu0 %236 }
  0x91   : > { %v402_v37 = vsub.f32 %v247_v35, %v967_v33  ;;  %v400_v38 = vsub.f32 %v237_v36, %v967_v33 }
  0x93   : > { %v441_v39 = vmul.f32 %v972_v34, %v402_v37  ;;  %v439_v40 = vmul.f32 %v972_v34, %v400_v38 }
  0x94   : > { %v252_v41 = vpop.permute.xlu1 %251  ;;  %v242_v42 = vpop.permute.xlu0 %241 }
  0x95   : > { %v473_v43 = vmul.f32 0.5, %v441_v39  ;;  %v471_v44 = vmul.f32 0.5, %v439_v40  ;;  %v403_v45 = vsub.f32 %v252_v41, %v967_v33  ;;  %v401_v46 = vsub.f32 %v242_v42, %v967_v33 }
  0x97   : > { %816 = vtanh.f32 %v473_v43  ;;  %v442_v47 = vmul.f32 %v972_v34, %v403_v45  ;;  %v440_v48 = vmul.f32 %v972_v34, %v401_v46 }
  0x98   : > { %818 = vtanh.f32 %v471_v44  ;;  %v262_v49 = vpop.permute.xlu1 %261  ;;  %v257_v50 = vpop.permute.xlu0 %256 }
  0x99   : > { %v474_v51 = vmul.f32 0.5, %v442_v47  ;;  %v472_v52 = vmul.f32 0.5, %v440_v48  ;;  %v405_v53 = vsub.f32 %v262_v49, %v967_v33  ;;  %v404_v54 = vsub.f32 %v257_v50, %v967_v33 }
  0x9b   : > { %820 = vtanh.f32 %v474_v51  ;;  %v444_v55 = vmul.f32 %v972_v34, %v405_v53  ;;  %v443_v56 = vmul.f32 %v972_v34, %v404_v54 }
  0x9c   : > { %822 = vtanh.f32 %v472_v52  ;;  %v272_v57 = vpop.permute.xlu1 %271  ;;  %v267_v58 = vpop.permute.xlu0 %266 }
  0x9d   : > { %v476_v59 = vmul.f32 0.5, %v444_v55  ;;  %v475_v60 = vmul.f32 0.5, %v443_v56  ;;  %v407_v61 = vsub.f32 %v272_v57, %v967_v33  ;;  %v406_v62 = vsub.f32 %v267_v58, %v967_v33 }
  0x9f   : > { %824 = vtanh.f32 %v476_v59  ;;  %v446_v63 = vmul.f32 %v972_v34, %v407_v61  ;;  %v445_v0 = vmul.f32 %v972_v34, %v406_v62 }
  0xa0   : > { %826 = vtanh.f32 %v475_v60  ;;  %v282_v1 = vpop.permute.xlu1 %281  ;;  %v277_v2 = vpop.permute.xlu0 %276 }
  0xa1   : > { %v817_v3 = vpop.eup %816  ;;  %v478_v4 = vmul.f32 0.5, %v446_v63  ;;  %v477_v5 = vmul.f32 0.5, %v445_v0  ;;  %v409_v6 = vsub.f32 %v282_v1, %v967_v33  ;;  %v408_v7 = vsub.f32 %v277_v2, %v967_v33 }
  0xa2   : > { %v819_v8 = vpop.eup %818  ;;  %v537_v9 = vmul.f32 0.5, %v817_v3 }
  0xa3   : > { %828 = vtanh.f32 %v478_v4  ;;  %v448_v10 = vmul.f32 %v972_v34, %v409_v6  ;;  %v447_v11 = vmul.f32 %v972_v34, %v408_v7  ;;  %v535_v12 = vmul.f32 0.5, %v819_v8 }
  0xa4   : > { %830 = vtanh.f32 %v477_v5  ;;  %v292_v13 = vpop.permute.xlu1 %291  ;;  %v287_v14 = vpop.permute.xlu0 %286  ;;  %v569_v23 = vadd.f32 0.5, %v537_v9 }
  0xa5   : > { %v821_v15 = vpop.eup %820  ;;  %v480_v16 = vmul.f32 0.5, %v448_v10  ;;  %v479_v17 = vmul.f32 0.5, %v447_v11  ;;  %v411_v18 = vsub.f32 %v292_v13, %v967_v33  ;;  %v410_v19 = vsub.f32 %v287_v14, %v967_v33 }
  0xa6   : > { %v823_v21 = vpop.eup %822  ;;  %v567_v22 = vadd.f32 0.5, %v535_v12  ;;  %v538_v30 = vmul.f32 0.5, %v821_v15  ;;  %v608_v39 = vmul.f32 %v999_v20, %v569_v23 }
  0xa7   : > { %832 = vtanh.f32 %v480_v16  ;;  %v450_v24 = vmul.f32 %v972_v34, %v411_v18  ;;  %v449_v25 = vmul.f32 %v972_v34, %v410_v19  ;;  %v536_v26 = vmul.f32 0.5, %v823_v21 }
  0xa8   : > { %834 = vtanh.f32 %v479_v17  ;;  %v302_v27 = vpop.permute.xlu1 %301  ;;  %v606_v28 = vmul.f32 %v999_v20, %v567_v22  ;;  %v297_v29 = vpop.permute.xlu0 %296  ;;  %v570_v47 = vadd.f32 0.5, %v538_v30 }
  0xa9   : > { %v825_v31 = vpop.eup %824  ;;  %v482_v32 = vmul.f32 0.5, %v450_v24  ;;  %v481_v35 = vmul.f32 0.5, %v449_v25  ;;  %v413_v36 = vsub.f32 %v302_v27, %v967_v33  ;;  %v412_v37 = vsub.f32 %v297_v29, %v967_v33 }
  0xaa   : > { %v827_v38 = vpop.eup %826  ;;  %638 = vadd.xlane.f32.xlu0 %v606_v28  ;;  %v568_v40 = vadd.f32 0.5, %v536_v26  ;;  %v540_v48 = vmul.f32 0.5, %v825_v31  ;;  %v609_v61 = vmul.f32 %v999_v20, %v570_v47 }
  0xab   : > { %836 = vtanh.f32 %v482_v32  ;;  %v452_v41 = vmul.f32 %v972_v34, %v413_v36  ;;  %v451_v42 = vmul.f32 %v972_v34, %v412_v37  ;;  %v539_v43 = vmul.f32 0.5, %v827_v38 }
  0xac   : > { %838 = vtanh.f32 %v481_v35  ;;  %v312_v44 = vpop.permute.xlu1 %311  ;;  %v607_v45 = vmul.f32 %v999_v20, %v568_v40  ;;  %v307_v46 = vpop.permute.xlu0 %306  ;;  %v572_v0 = vadd.f32 0.5, %v540_v48 }
  0xad   : > { %v829_v49 = vpop.eup %828  ;;  %v484_v50 = vmul.f32 0.5, %v452_v41  ;;  %v483_v51 = vmul.f32 0.5, %v451_v42  ;;  %v415_v52 = vsub.f32 %v312_v44, %v967_v33  ;;  %v414_v53 = vsub.f32 %v307_v46, %v967_v33 }
  0xae   : > { %v831_v54 = vpop.eup %830  ;;  %642 = vadd.xlane.f32.xlu0 %v608_v39  ;;  %640 = vadd.xlane.f32.xlu1 %v607_v45  ;;  %v571_v55 = vadd.f32 0.5, %v539_v43  ;;  %v542_v56 = vmul.f32 0.5, %v829_v49  ;;  %v611_v13 = vmul.f32 %v999_v20, %v572_v0 }
  0xaf   : > { %840 = vtanh.f32 %v484_v50  ;;  %v454_v57 = vmul.f32 %v972_v34, %v415_v52  ;;  %v453_v58 = vmul.f32 %v972_v34, %v414_v53  ;;  %v541_v59 = vmul.f32 0.5, %v831_v54 }
  0xb0   : > { %842 = vtanh.f32 %v483_v51  ;;  %v322_v60 = vpop.permute.xlu1 %321  ;;  %v610_v62 = vmul.f32 %v999_v20, %v571_v55  ;;  %v317_v63 = vpop.permute.xlu0 %316  ;;  %v574_v8 = vadd.f32 0.5, %v542_v56 }
  0xb1   : > { %v833_v1 = vpop.eup %832  ;;  %v486_v2 = vmul.f32 0.5, %v454_v57  ;;  %v485_v3 = vmul.f32 0.5, %v453_v58  ;;  %v417_v4 = vsub.f32 %v322_v60, %v967_v33  ;;  %v416_v5 = vsub.f32 %v317_v63, %v967_v33 }
  0xb2   : > { %v835_v6 = vpop.eup %834  ;;  %644 = vadd.xlane.f32.xlu0 %v609_v61  ;;  %646 = vadd.xlane.f32.xlu1 %v610_v62  ;;  %v573_v7 = vadd.f32 0.5, %v541_v59  ;;  %v544_v16 = vmul.f32 0.5, %v833_v1  ;;  %v613_v24 = vmul.f32 %v999_v20, %v574_v8 }
  0xb3   : > { %844 = vtanh.f32 %v486_v2  ;;  %v456_v9 = vmul.f32 %v972_v34, %v417_v4  ;;  %v455_v10 = vmul.f32 %v972_v34, %v416_v5  ;;  %v543_v11 = vmul.f32 0.5, %v835_v6 }
  0xb4   : > { %846 = vtanh.f32 %v485_v3  ;;  %v332_v12 = vpop.permute.xlu1 %331  ;;  %v612_v14 = vmul.f32 %v999_v20, %v573_v7  ;;  %v327_v15 = vpop.permute.xlu0 %326  ;;  %v576_v32 = vadd.f32 0.5, %v544_v16 }
  0xb5   : > { %v837_v17 = vpop.eup %836  ;;  %v488_v18 = vmul.f32 0.5, %v456_v9  ;;  %v487_v19 = vmul.f32 0.5, %v455_v10  ;;  %v419_v21 = vsub.f32 %v332_v12, %v967_v33  ;;  %v418_v22 = vsub.f32 %v327_v15, %v967_v33 }
  0xb6   : > { %v839_v23 = vpop.eup %838  ;;  %648 = vadd.xlane.f32.xlu0 %v611_v13  ;;  %650 = vadd.xlane.f32.xlu1 %v612_v14  ;;  %v575_v25 = vadd.f32 0.5, %v543_v11  ;;  %v546_v35 = vmul.f32 0.5, %v837_v17  ;;  %v615_v48 = vmul.f32 %v999_v20, %v576_v32 }
  0xb7   : > { %848 = vtanh.f32 %v488_v18  ;;  %v458_v26 = vmul.f32 %v972_v34, %v419_v21  ;;  %v457_v27 = vmul.f32 %v972_v34, %v418_v22  ;;  %v545_v28 = vmul.f32 0.5, %v839_v23 }
  0xb8   : > { %850 = vtanh.f32 %v487_v19  ;;  %v342_v29 = vpop.permute.xlu1 %341  ;;  %v614_v30 = vmul.f32 %v999_v20, %v575_v25  ;;  %v337_v31 = vpop.permute.xlu0 %336  ;;  %v578_v51 = vadd.f32 0.5, %v546_v35 }
  0xb9   : > { %v841_v36 = vpop.eup %840  ;;  %v490_v37 = vmul.f32 0.5, %v458_v26  ;;  %v489_v38 = vmul.f32 0.5, %v457_v27  ;;  %v421_v39 = vsub.f32 %v342_v29, %v967_v33  ;;  %v420_v40 = vsub.f32 %v337_v31, %v967_v33 }
  0xba   : > { %v843_v41 = vpop.eup %842  ;;  %652 = vadd.xlane.f32.xlu0 %v613_v24  ;;  %654 = vadd.xlane.f32.xlu1 %v614_v30  ;;  %v577_v42 = vadd.f32 0.5, %v545_v28  ;;  %v548_v43 = vmul.f32 0.5, %v841_v36  ;;  %v617_v0 = vmul.f32 %v999_v20, %v578_v51 }
  0xbb   : > { %852 = vtanh.f32 %v490_v37  ;;  %v460_v44 = vmul.f32 %v972_v34, %v421_v39  ;;  %v459_v45 = vmul.f32 %v972_v34, %v420_v40  ;;  %v547_v46 = vmul.f32 0.5, %v843_v41 }
  0xbc   : > { %854 = vtanh.f32 %v489_v38  ;;  %v352_v47 = vpop.permute.xlu1 %351  ;;  %v616_v49 = vmul.f32 %v999_v20, %v577_v42  ;;  %v347_v50 = vpop.permute.xlu0 %346  ;;  %v580_v59 = vadd.f32 0.5, %v548_v43 }
  0xbd   : > { %v845_v52 = vpop.eup %844  ;;  %v492_v53 = vmul.f32 0.5, %v460_v44  ;;  %v491_v54 = vmul.f32 0.5, %v459_v45  ;;  %v423_v55 = vsub.f32 %v352_v47, %v967_v33  ;;  %v422_v56 = vsub.f32 %v347_v50, %v967_v33 }
  0xbe   : > { %v847_v57 = vpop.eup %846  ;;  %656 = vadd.xlane.f32.xlu0 %v615_v48  ;;  %658 = vadd.xlane.f32.xlu1 %v616_v49  ;;  %v579_v58 = vadd.f32 0.5, %v547_v46  ;;  %v550_v3 = vmul.f32 0.5, %v845_v52  ;;  %v619_v10 = vmul.f32 %v999_v20, %v580_v59 }
  0xbf   : > { %856 = vtanh.f32 %v492_v53  ;;  %v462_v60 = vmul.f32 %v972_v34, %v423_v55  ;;  %v461_v61 = vmul.f32 %v972_v34, %v422_v56  ;;  %v549_v62 = vmul.f32 0.5, %v847_v57 }
  0xc0   : > { %858 = vtanh.f32 %v491_v54  ;;  %v362_v63 = vpop.permute.xlu1 %361  ;;  %v618_v1 = vmul.f32 %v999_v20, %v579_v58  ;;  %v357_v2 = vpop.permute.xlu0 %356  ;;  %v582_v18 = vadd.f32 0.5, %v550_v3 }
  0xc1   : > { %v849_v4 = vpop.eup %848  ;;  %v494_v5 = vmul.f32 0.5, %v462_v60  ;;  %v493_v6 = vmul.f32 0.5, %v461_v61  ;;  %v425_v7 = vsub.f32 %v362_v63, %v967_v33  ;;  %v424_v8 = vsub.f32 %v357_v2, %v967_v33 }
  0xc2   : > { %v851_v9 = vpop.eup %850  ;;  %660 = vadd.xlane.f32.xlu0 %v617_v0  ;;  %662 = vadd.xlane.f32.xlu1 %v618_v1  ;;  %v581_v11 = vadd.f32 0.5, %v549_v62  ;;  %v552_v19 = vmul.f32 0.5, %v849_v4  ;;  %v621_v35 = vmul.f32 %v999_v20, %v582_v18 }
  0xc3   : > { %860 = vtanh.f32 %v494_v5  ;;  %v464_v12 = vmul.f32 %v972_v34, %v425_v7  ;;  %v463_v13 = vmul.f32 %v972_v34, %v424_v8  ;;  %v551_v14 = vmul.f32 0.5, %v851_v9 }
  0xc4   : > { %862 = vtanh.f32 %v493_v6  ;;  %v372_v15 = vpop.permute.xlu1 %371  ;;  %v620_v16 = vmul.f32 %v999_v20, %v581_v11  ;;  %v367_v17 = vpop.permute.xlu0 %366  ;;  %v584_v38 = vadd.f32 0.5, %v552_v19 }
  0xc5   : > { %v853_v21 = vpop.eup %852  ;;  %v496_v22 = vmul.f32 0.5, %v464_v12  ;;  %v495_v23 = vmul.f32 0.5, %v463_v13  ;;  %v427_v24 = vsub.f32 %v372_v15, %v967_v33  ;;  %v426_v25 = vsub.f32 %v367_v17, %v967_v33 }
  0xc6   : > { %v855_v26 = vpop.eup %854  ;;  %664 = vadd.xlane.f32.xlu0 %v619_v10  ;;  %666 = vadd.xlane.f32.xlu1 %v620_v16  ;;  %v583_v27 = vadd.f32 0.5, %v551_v14  ;;  %v554_v28 = vmul.f32 0.5, %v853_v21  ;;  %v623_v51 = vmul.f32 %v999_v20, %v584_v38 }
  0xc7   : > { %864 = vtanh.f32 %v496_v22  ;;  %v466_v29 = vmul.f32 %v972_v34, %v427_v24  ;;  %v465_v30 = vmul.f32 %v972_v34, %v426_v25  ;;  %v553_v31 = vmul.f32 0.5, %v855_v26 }
  0xc8   : > { %866 = vtanh.f32 %v495_v23  ;;  %v382_v32 = vpop.permute.xlu1 %381  ;;  %v622_v36 = vmul.f32 %v999_v20, %v583_v27  ;;  %v377_v37 = vpop.permute.xlu0 %376  ;;  %v586_v46 = vadd.f32 0.5, %v554_v28 }
  0xc9   : > { %v857_v39 = vpop.eup %856  ;;  %v498_v40 = vmul.f32 0.5, %v466_v29  ;;  %v497_v41 = vmul.f32 0.5, %v465_v30  ;;  %v429_v42 = vsub.f32 %v382_v32, %v967_v33  ;;  %v428_v43 = vsub.f32 %v377_v37, %v967_v33 }
  0xca   : > { %v859_v44 = vpop.eup %858  ;;  %668 = vadd.xlane.f32.xlu0 %v621_v35  ;;  %670 = vadd.xlane.f32.xlu1 %v622_v36  ;;  %v585_v45 = vadd.f32 0.5, %v553_v31  ;;  %v556_v54 = vmul.f32 0.5, %v857_v39  ;;  %v625_v61 = vmul.f32 %v999_v20, %v586_v46 }
  0xcb   : > { %868 = vtanh.f32 %v498_v40  ;;  %v468_v47 = vmul.f32 %v972_v34, %v429_v42  ;;  %v467_v48 = vmul.f32 %v972_v34, %v428_v43  ;;  %v555_v49 = vmul.f32 0.5, %v859_v44 }
  0xcc   : > { %870 = vtanh.f32 %v497_v41  ;;  %v392_v50 = vpop.permute.xlu1 %391  ;;  %v624_v52 = vmul.f32 %v999_v20, %v585_v45  ;;  %v387_v53 = vpop.permute.xlu0 %386  ;;  %v588_v3 = vadd.f32 0.5, %v556_v54 }
  0xcd   : > { %v861_v55 = vpop.eup %860  ;;  %v500_v56 = vmul.f32 0.5, %v468_v47  ;;  %v499_v57 = vmul.f32 0.5, %v467_v48  ;;  %v431_v58 = vsub.f32 %v392_v50, %v967_v33  ;;  %v430_v59 = vsub.f32 %v387_v53, %v967_v33 }
  0xce   : > { %v863_v60 = vpop.eup %862  ;;  %672 = vadd.xlane.f32.xlu0 %v623_v51  ;;  %674 = vadd.xlane.f32.xlu1 %v624_v52  ;;  %v587_v62 = vadd.f32 0.5, %v555_v49  ;;  %v558_v4 = vmul.f32 0.5, %v861_v55 }
  0xcf   : > { %872 = vtanh.f32 %v500_v56  ;;  %v470_v63 = vmul.f32 %v972_v34, %v431_v58  ;;  %v469_v0 = vmul.f32 %v972_v34, %v430_v59  ;;  %v557_v1 = vmul.f32 0.5, %v863_v60 }
  0xd0   : > { %874 = vtanh.f32 %v499_v57  ;;  %v626_v2 = vmul.f32 %v999_v20, %v587_v62  ;;  %v627_v34 = vmul.f32 %v999_v20, %v588_v3  ;;  %v590_v11 = vadd.f32 0.5, %v558_v4 }
  0xd1   : > { %v865_v5 = vpop.eup %864  ;;  %v502_v6 = vmul.f32 0.5, %v470_v63  ;;  %v501_v33 = vmul.f32 0.5, %v469_v0  ;;  %v589_v7 = vadd.f32 0.5, %v557_v1 }
  0xd2   : > { %v867_v8 = vpop.eup %866  ;;  %676 = vadd.xlane.f32.xlu0 %v625_v61  ;;  %678 = vadd.xlane.f32.xlu1 %v626_v2  ;;  %v560_v12 = vmul.f32 0.5, %v865_v5  ;;  %v629_v18 = vmul.f32 %v999_v20, %v590_v11 }
  0xd3   : > { %876 = vtanh.f32 %v502_v6  ;;  %v628_v9 = vmul.f32 %v999_v20, %v589_v7  ;;  %v559_v10 = vmul.f32 0.5, %v867_v8 }
  0xd4   : > { %878 = vtanh.f32 %v501_v33  ;;  %v592_v19 = vadd.f32 0.5, %v560_v12 }
  0xd5   : > { %v869_v13 = vpop.eup %868  ;;  %v591_v14 = vadd.f32 0.5, %v559_v10 }
  0xd6   : > { %v871_v15 = vpop.eup %870  ;;  %680 = vadd.xlane.f32.xlu0 %v627_v34  ;;  %682 = vadd.xlane.f32.xlu1 %v628_v9  ;;  %v562_v21 = vmul.f32 0.5, %v869_v13  ;;  %v631_v27 = vmul.f32 %v999_v20, %v592_v19 }
  0xd7   : > { %v630_v16 = vmul.f32 %v999_v20, %v591_v14  ;;  %v561_v17 = vmul.f32 0.5, %v871_v15 }
  0xd8   : > { %v594_v28 = vadd.f32 0.5, %v562_v21 }
  0xd9   : > { %v873_v22 = vpop.eup %872  ;;  %v593_v23 = vadd.f32 0.5, %v561_v17 }
  0xda   : > { %v875_v24 = vpop.eup %874  ;;  %684 = vadd.xlane.f32.xlu0 %v629_v18  ;;  %686 = vadd.xlane.f32.xlu1 %v630_v16  ;;  %v564_v29 = vmul.f32 0.5, %v873_v22  ;;  %v633_v38 = vmul.f32 %v999_v20, %v594_v28 }
  0xdb   : > { %v632_v25 = vmul.f32 %v999_v20, %v593_v23  ;;  %v563_v26 = vmul.f32 0.5, %v875_v24 }
  0xdc   : > { %v596_v39 = vadd.f32 0.5, %v564_v29 }
  0xdd   : > { %v877_v30 = vpop.eup %876  ;;  %v595_v31 = vadd.f32 0.5, %v563_v26 }
  0xde   : > { %v879_v32 = vpop.eup %878  ;;  %688 = vadd.xlane.f32.xlu0 %v631_v27  ;;  %690 = vadd.xlane.f32.xlu1 %v632_v25  ;;  %v566_v35 = vmul.f32 0.5, %v877_v30  ;;  %v635_v44 = vmul.f32 %v999_v20, %v596_v39 }
  0xdf   : > { %v634_v36 = vmul.f32 %v999_v20, %v595_v31  ;;  %v565_v37 = vmul.f32 0.5, %v879_v32 }
  0xe0   : > { %v598_v40 = vadd.f32 0.5, %v566_v35 }
  0xe1   : > { %v597_v41 = vadd.f32 0.5, %v565_v37 }
  0xe2   : > { %692 = vadd.xlane.f32.xlu0 %v633_v38  ;;  %694 = vadd.xlane.f32.xlu1 %v634_v36  ;;  %v637_v42 = vmul.f32 %v999_v20, %v598_v40 }
  0xe3   : > { %v636_v43 = vmul.f32 %v999_v20, %v597_v41 }
  0xe6   : > { %696 = vadd.xlane.f32.xlu0 %v635_v44  ;;  %698 = vadd.xlane.f32.xlu1 %v636_v43 }
  0xea   : > { %700 = vadd.xlane.f32.xlu0 %v637_v42 }
 0x137   : > { %v639_v45 = vpop.xlane.xlu0 %638 }
 0x138   : > { %703 = vst.msk [vmem:[%s1080_s30] sm:$0xff] %vm702_vm0, %v639_v45 }
 0x13b   : > { %v641_v20 = vpop.xlane.xlu1 %640  ;;  %v643_v46 = vpop.xlane.xlu0 %642 }
 0x13c   : > { %704 = vst.msk [vmem:[%s1080_s30 + $0x8] sm:$0xff] %vm702_vm0, %v641_v20  ;;  %705 = vst.msk [vmem:[%s1080_s30 + $0x10] sm:$0xff] %vm702_vm0, %v643_v46 }
 0x13f   : > { %v647_v47 = vpop.xlane.xlu1 %646  ;;  %v645_v48 = vpop.xlane.xlu0 %644 }
 0x140   : > { %707 = vst.msk [vmem:[%s1080_s30 + $0x20] sm:$0xff] %vm702_vm0, %v647_v47  ;;  %706 = vst.msk [vmem:[%s1080_s30 + $0x18] sm:$0xff] %vm702_vm0, %v645_v48 }
 0x143   : > { %v651_v49 = vpop.xlane.xlu1 %650  ;;  %v649_v50 = vpop.xlane.xlu0 %648 }
 0x144   : > { %709 = vst.msk [vmem:[%s1080_s30 + $0x30] sm:$0xff] %vm702_vm0, %v651_v49  ;;  %708 = vst.msk [vmem:[%s1080_s30 + $0x28] sm:$0xff] %vm702_vm0, %v649_v50 }
 0x147   : > { %v655_v51 = vpop.xlane.xlu1 %654  ;;  %v653_v52 = vpop.xlane.xlu0 %652 }
 0x148   : > { %711 = vst.msk [vmem:[%s1080_s30 + $0x40] sm:$0xff] %vm702_vm0, %v655_v51  ;;  %710 = vst.msk [vmem:[%s1080_s30 + $0x38] sm:$0xff] %vm702_vm0, %v653_v52 }
 0x14b   : > { %v659_v53 = vpop.xlane.xlu1 %658  ;;  %v657_v54 = vpop.xlane.xlu0 %656 }
 0x14c   : > { %713 = vst.msk [vmem:[%s1080_s30 + $0x50] sm:$0xff] %vm702_vm0, %v659_v53  ;;  %712 = vst.msk [vmem:[%s1080_s30 + $0x48] sm:$0xff] %vm702_vm0, %v657_v54 }
 0x14f   : > { %v663_v55 = vpop.xlane.xlu1 %662  ;;  %v661_v56 = vpop.xlane.xlu0 %660 }
 0x150   : > { %715 = vst.msk [vmem:[%s1080_s30 + $0x60] sm:$0xff] %vm702_vm0, %v663_v55  ;;  %714 = vst.msk [vmem:[%s1080_s30 + $0x58] sm:$0xff] %vm702_vm0, %v661_v56 }
 0x153   : > { %v667_v57 = vpop.xlane.xlu1 %666  ;;  %v665_v58 = vpop.xlane.xlu0 %664 }
 0x154   : > { %717 = vst.msk [vmem:[%s1080_s30 + $0x70] sm:$0xff] %vm702_vm0, %v667_v57  ;;  %716 = vst.msk [vmem:[%s1080_s30 + $0x68] sm:$0xff] %vm702_vm0, %v665_v58 }
 0x157   : > { %v671_v59 = vpop.xlane.xlu1 %670  ;;  %v669_v60 = vpop.xlane.xlu0 %668 }
 0x158   : > { %719 = vst.msk [vmem:[%s1080_s30 + $0x80] sm:$0xff] %vm702_vm0, %v671_v59  ;;  %718 = vst.msk [vmem:[%s1080_s30 + $0x78] sm:$0xff] %vm702_vm0, %v669_v60 }
 0x15b   : > { %v675_v61 = vpop.xlane.xlu1 %674  ;;  %v673_v62 = vpop.xlane.xlu0 %672 }
 0x15c   : > { %721 = vst.msk [vmem:[%s1080_s30 + $0x90] sm:$0xff] %vm702_vm0, %v675_v61  ;;  %720 = vst.msk [vmem:[%s1080_s30 + $0x88] sm:$0xff] %vm702_vm0, %v673_v62 }
 0x15f   : > { %v679_v63 = vpop.xlane.xlu1 %678  ;;  %v677_v0 = vpop.xlane.xlu0 %676 }
 0x160   : > { %723 = vst.msk [vmem:[%s1080_s30 + $0xa0] sm:$0xff] %vm702_vm0, %v679_v63  ;;  %722 = vst.msk [vmem:[%s1080_s30 + $0x98] sm:$0xff] %vm702_vm0, %v677_v0 }
 0x163   : > { %v683_v1 = vpop.xlane.xlu1 %682  ;;  %v681_v2 = vpop.xlane.xlu0 %680 }
 0x164   : > { %725 = vst.msk [vmem:[%s1080_s30 + $0xb0] sm:$0xff] %vm702_vm0, %v683_v1  ;;  %724 = vst.msk [vmem:[%s1080_s30 + $0xa8] sm:$0xff] %vm702_vm0, %v681_v2 }
 0x167   : > { %v687_v3 = vpop.xlane.xlu1 %686  ;;  %v685_v4 = vpop.xlane.xlu0 %684 }
 0x168   : > { %727 = vst.msk [vmem:[%s1080_s30 + $0xc0] sm:$0xff] %vm702_vm0, %v687_v3  ;;  %726 = vst.msk [vmem:[%s1080_s30 + $0xb8] sm:$0xff] %vm702_vm0, %v685_v4 }
 0x16b   : > { %v691_v5 = vpop.xlane.xlu1 %690  ;;  %v689_v6 = vpop.xlane.xlu0 %688 }
 0x16c   : > { %729 = vst.msk [vmem:[%s1080_s30 + $0xd0] sm:$0xff] %vm702_vm0, %v691_v5  ;;  %728 = vst.msk [vmem:[%s1080_s30 + $0xc8] sm:$0xff] %vm702_vm0, %v689_v6 }
 0x16f   : > { %v695_v33 = vpop.xlane.xlu1 %694  ;;  %v693_v7 = vpop.xlane.xlu0 %692 }
 0x170   : > { %731 = vst.msk [vmem:[%s1080_s30 + $0xe0] sm:$0xff] %vm702_vm0, %v695_v33  ;;  %730 = vst.msk [vmem:[%s1080_s30 + $0xd8] sm:$0xff] %vm702_vm0, %v693_v7 }
 0x173   : > { %v699_v8 = vpop.xlane.xlu1 %698  ;;  %v697_v9 = vpop.xlane.xlu0 %696 }
 0x174   : > { %733 = vst.msk [vmem:[%s1080_s30 + $0xf0] sm:$0xff] %vm702_vm0, %v699_v8  ;;  %732 = vst.msk [vmem:[%s1080_s30 + $0xe8] sm:$0xff] %vm702_vm0, %v697_v9 }
 0x177   : > { %v701_v10 = vpop.xlane.xlu0 %700 }
 0x178   : > { %734 = vst.msk [vmem:[%s1080_s30 + $0xf8] sm:$0xff] %vm702_vm0, %v701_v10 }
 0x179 PF: > { %s14_s15 = sadd.s32 1, %s886_s15  }
 0x17a   : > { %p11_p4 = scmp.ge.s32.totalorder %s14_s15, 6  }
 0x17c   :  { %13 = sbr.rel (!%p11_p4) target bundleno = 1 (0x1), region = 66 }

</bundles_post_ra>
